<compile_context>
chip_gen: v7x
topology: tpu7x:2x2x1
jax: 0.10.0
libtpu: 0.0.40
codegen_flags: <defaults>
</compile_context>

<pallas_src>
import jax
import jax.numpy as jnp
from jax.experimental import pallas as pl
from jax.experimental.pallas import tpu as pltpu


# ---------------------------------------------------------------------------
# Kernels: VPU elementwise adds with in-kernel dtype promotion.
# Bodies are rank-agnostic (used for both 2-D tiles and 1-D full blocks).
# ---------------------------------------------------------------------------
def _fuse2_kernel(e_ref, b_ref, o_ref):
    dt = o_ref.dtype
    o_ref[...] = e_ref[...].astype(dt) + b_ref[...].astype(dt)


def _fuse3_kernel(e_ref, b_ref, s_ref, o_ref):
    dt = o_ref.dtype
    o_ref[...] = (e_ref[...].astype(dt) + b_ref[...].astype(dt)
                  + s_ref[...].astype(dt))


# ---------------------------------------------------------------------------
# Tiling policy
# ---------------------------------------------------------------------------
_ROW_ALIGN = 32            # second-minor alignment covering f32(8)/bf16(16)/i8&fp8(32)
_SMALL_ODD_BYTES = 8 << 20  # odd-numel arrays up to this size -> single full block


def _tiling_config():
    """(per-input tile bytes, scoped-VMEM limit) adapted to the chip's VMEM.

    Worst case buffers: (3 inputs + 1 output) x double-buffer x tile_bytes.
      v5e/v6e (128 MiB VMEM): 8 MiB tiles -> 64 MiB buffers, 80 MiB limit.
      v7x / unknown (64 MiB): 4 MiB tiles -> 32 MiB buffers, 48 MiB limit.
    """
    capacity = None
    try:
        capacity = int(pltpu.get_tpu_info().vmem_capacity_bytes)
    except Exception:
        capacity = None
    if capacity is not None and capacity >= (128 << 20):
        return 8 << 20, 80 << 20
    return 4 << 20, 48 << 20


def _choose_lane_width(total):
    """Largest lane width in {1024,512,256,128} dividing `total`
    (caller guarantees total % 128 == 0)."""
    for cand in (1024, 512, 256, 128):
        if total % cand == 0:
            return cand
    raise AssertionError("caller must guarantee total % 128 == 0")


def _fused_add_2d(x2d, out_dtype, n_valid):
    """Streamed, tiled elementwise add over lane-dense (rows, lane_c) slabs."""
    rows, lane_c = x2d[0].shape
    tile_bytes, vmem_limit = _tiling_config()
    itemsize = jnp.dtype(out_dtype).itemsize

    # Byte budget alone sets tile_rows (no artificial row cap).
    tile_rows = (tile_bytes // (lane_c * itemsize)) // _ROW_ALIGN * _ROW_ALIGN
    tile_rows = max(_ROW_ALIGN, tile_rows)
    if tile_rows >= rows:
        if rows >= 2 * _ROW_ALIGN:
            # Split sizeable single-block cases into >= 2 steps so both v7x
            # TensorCores get work and DMA/compute pipelining kicks in.
            half = (rows + 1) // 2
            tile_rows = ((half + _ROW_ALIGN - 1) // _ROW_ALIGN) * _ROW_ALIGN
        else:
            tile_rows = rows  # tiny: one full-extent block (no alignment constraint)

    grid = (pl.cdiv(rows, tile_rows),)  # ragged trailing row-block handled by Pallas
    spec = pl.BlockSpec((tile_rows, lane_c), lambda i: (i, 0))
    kernel = _fuse2_kernel if len(x2d) == 2 else _fuse3_kernel

    in_bytes = sum(int(a.size) * jnp.dtype(a.dtype).itemsize for a in x2d)
    cost = pl.CostEstimate(
        flops=(len(x2d) - 1) * int(n_valid),
        transcendentals=0,
        bytes_accessed=in_bytes + rows * lane_c * itemsize,
    )

    return pl.pallas_call(
        kernel,
        out_shape=jax.ShapeDtypeStruct((rows, lane_c), out_dtype),
        grid=grid,
        in_specs=[spec] * len(x2d),
        out_specs=spec,
        compiler_params=pltpu.CompilerParams(
            dimension_semantics=("parallel",),
            vmem_limit_bytes=vmem_limit,
        ),
        cost_estimate=cost,
    )(*x2d)


# ---------------------------------------------------------------------------
# Wrapper
# ---------------------------------------------------------------------------
def multimodal_fusion(emotional, behavioral, social=None):
    """Pallas implementation of MultimodalFusion.forward."""
    if emotional.shape != behavioral.shape:
        raise ValueError("emotional/behavioral shape mismatch")
    if social is not None and social.shape != emotional.shape:
        raise ValueError("social shape mismatch")

    shape = emotional.shape
    inputs = [emotional, behavioral] + ([social] if social is not None else [])
    out_dtype = jnp.result_type(*[a.dtype for a in inputs])
    out_itemsize = jnp.dtype(out_dtype).itemsize

    total = 1
    for d in shape:
        total *= d
    if total == 0:
        return jnp.zeros(shape, out_dtype)

    kernel = _fuse2_kernel if social is None else _fuse3_kernel

    # --- fast path: numel is a multiple of 128 -> free reshape to lane-dense 2D
    if total % 128 == 0:
        lane_c = _choose_lane_width(total)
        rows = total // lane_c
        x2d = [a.reshape(rows, lane_c) for a in inputs]
        out2d = _fused_add_2d(x2d, out_dtype, total)
        return out2d.reshape(shape)

    # --- odd numel, small: one full-array VMEM block (no pad, no slice pass)
    if total * out_itemsize <= _SMALL_ODD_BYTES:
        _, vmem_limit = _tiling_config()
        flat = [a.reshape(-1) for a in inputs]
        cost = pl.CostEstimate(
            flops=(len(flat) - 1) * total,
            transcendentals=0,
            bytes_accessed=sum(int(a.size) * jnp.dtype(a.dtype).itemsize for a in flat)
            + total * out_itemsize,
        )
        out = pl.pallas_call(
            kernel,
            out_shape=jax.ShapeDtypeStruct((total,), out_dtype),
            compiler_params=pltpu.CompilerParams(vmem_limit_bytes=vmem_limit),
            cost_estimate=cost,
        )(*flat)
        return out.reshape(shape)

    # --- odd numel, large: pad to a lane multiple, tiled path, slice back.
    # TODO(synk): replace pad + trailing slice (one extra HBM pass each) with an
    # in-kernel masked tail store (scalar `total` in SMEM + pltpu.store mask).
    pad = (-total) % 128
    lane_c = 128
    flat = [jnp.pad(a.reshape(-1), (0, pad)) for a in inputs]
    rows = (total + pad) // lane_c
    x2d = [a.reshape(rows, lane_c) for a in flat]
    out2d = _fused_add_2d(x2d, out_dtype, total)
    return out2d.reshape(-1)[:total].reshape(shape)


# ---------------------------------------------------------------------------
# Reference
# ---------------------------------------------------------------------------
def multimodal_fusion_ref(emotional, behavioral, social=None):
    fused = emotional + behavioral
    if social is not None:
        fused = fused + social
    return fused


if __name__ == "__main__":
    key = jax.random.PRNGKey(0)
    k1, k2, k3 = jax.random.split(key, 3)

    # Small shape consistent with the module: batch=2, seq=8, hidden=32.
    shape = (2, 8, 32)
    emotional = jax.random.normal(k1, shape, dtype=jnp.float32)
    behavioral = jax.random.normal(k2, shape, dtype=jnp.float32)
    social = jax.random.normal(k3, shape, dtype=jnp.float32)

    # 3-input path
    out3 = multimodal_fusion(emotional, behavioral, social)
    jax.block_until_ready(out3)
    ref3 = multimodal_fusion_ref(emotional, behavioral, social)
    assert out3.shape == shape and out3.dtype == jnp.float32
    assert jnp.allclose(out3, ref3, atol=1e-6), "mismatch (3-input)"

    # 2-input path (Optional social=None)
    out2 = multimodal_fusion(emotional, behavioral, None)
    jax.block_until_ready(out2)
    assert jnp.allclose(out2, multimodal_fusion_ref(emotional, behavioral, None),
                        atol=1e-6), "mismatch (2-input)"

    # Mixed-dtype promotion path (f32 + bf16 -> f32), now cast inside the kernel.
    beh_bf16 = behavioral.astype(jnp.bfloat16)
    out_mix = multimodal_fusion(emotional, beh_bf16, None)
    jax.block_until_ready(out_mix)
    ref_mix = emotional + beh_bf16.astype(jnp.float32)
    assert out_mix.dtype == jnp.float32
    assert jnp.allclose(out_mix, ref_mix, atol=1e-2), "mismatch (mixed dtype)"

    # Multi-step streaming path: >= 2 grid blocks + ragged trailing row block.
    shape_big = (8, 96, 128)
    kb1, kb2, kb3 = jax.random.split(jax.random.PRNGKey(1), 3)
    eb = jax.random.normal(kb1, shape_big, dtype=jnp.float32)
    bb = jax.random.normal(kb2, shape_big, dtype=jnp.float32)
    sb = jax.random.normal(kb3, shape_big, dtype=jnp.float32)
    out_big = multimodal_fusion(eb, bb, sb)
    jax.block_until_ready(out_big)
    assert jnp.allclose(out_big, multimodal_fusion_ref(eb, bb, sb), atol=1e-6), \
        "mismatch (multi-step)"

    # Odd numel (not a multiple of 128): single full-block path, no pad/slice.
    shape_odd = (3, 30, 37)
    ko1, ko2, ko3 = jax.random.split(jax.random.PRNGKey(2), 3)
    eo = jax.random.normal(ko1, shape_odd, dtype=jnp.float32)
    bo = jax.random.normal(ko2, shape_odd, dtype=jnp.float32)
    so = jax.random.normal(ko3, shape_odd, dtype=jnp.float32)
    out_odd = multimodal_fusion(eo, bo, so)
    jax.block_until_ready(out_odd)
    assert jnp.allclose(out_odd, multimodal_fusion_ref(eo, bo, so), atol=1e-6), \
        "mismatch (odd shape)"

    print("KERNEL_OK")
</pallas_src>

<mosaic_0001>
module attributes {stable_mosaic.version = 11 : i64} {
  func.func @_fuse3_kernel(%arg0: i32, %arg1: memref<1x512xf32, #tpu.memory_space<vmem>>, %arg2: memref<1x512xf32, #tpu.memory_space<vmem>>, %arg3: memref<1x512xf32, #tpu.memory_space<vmem>>, %arg4: memref<1x512xf32, #tpu.memory_space<vmem>>) attributes {dimension_semantics = [#tpu.dimension_semantics<parallel>], iteration_bounds = array<i64: 1>, scalar_prefetch = 0 : i64, scratch_operands = 0 : i64, tpu.core_type = #tpu.core_type<tc>, window_params = [{transform_indices = @transform_0, window_bounds = array<i64: 1, 512>}, {transform_indices = @transform_1, window_bounds = array<i64: 1, 512>}, {transform_indices = @transform_2, window_bounds = array<i64: 1, 512>}, {transform_indices = @transform_3, window_bounds = array<i64: 1, 512>}]} {
    %c0 = arith.constant 0 : index
    %c0_0 = arith.constant 0 : index
    %0 = vector.load %arg1[%c0, %c0_0] : memref<1x512xf32, #tpu.memory_space<vmem>>, vector<1x512xf32>
    %c0_1 = arith.constant 0 : index
    %c0_2 = arith.constant 0 : index
    %1 = vector.load %arg2[%c0_1, %c0_2] : memref<1x512xf32, #tpu.memory_space<vmem>>, vector<1x512xf32>
    %2 = arith.addf %0, %1 : vector<1x512xf32>
    %c0_3 = arith.constant 0 : index
    %c0_4 = arith.constant 0 : index
    %3 = vector.load %arg3[%c0_3, %c0_4] : memref<1x512xf32, #tpu.memory_space<vmem>>, vector<1x512xf32>
    %4 = arith.addf %2, %3 : vector<1x512xf32>
    %c0_5 = arith.constant 0 : index
    %c0_6 = arith.constant 0 : index
    %5 = vector.load %arg4[%c0_5, %c0_6] : memref<1x512xf32, #tpu.memory_space<vmem>>, vector<1x512xf32>
    tpu.vector_store %arg4[%c0_5, %c0_6], %4 {strides = array<i32>} : memref<1x512xf32, #tpu.memory_space<vmem>>, vector<1x512xf32>,
    return
  }
  func.func @transform_0(%arg0: i32) -> (i32, i32) {
    %c0_i32 = arith.constant 0 : i32
    %c0_i32_0 = arith.constant 0 : i32
    return %arg0, %c0_i32 : i32, i32
  }
  func.func @transform_1(%arg0: i32) -> (i32, i32) {
    %c0_i32 = arith.constant 0 : i32
    %c0_i32_0 = arith.constant 0 : i32
    return %arg0, %c0_i32 : i32, i32
  }
  func.func @transform_2(%arg0: i32) -> (i32, i32) {
    %c0_i32 = arith.constant 0 : i32
    %c0_i32_0 = arith.constant 0 : i32
    return %arg0, %c0_i32 : i32, i32
  }
  func.func @transform_3(%arg0: i32) -> (i32, i32) {
    %c0_i32 = arith.constant 0 : i32
    %c0_i32_0 = arith.constant 0 : i32
    return %arg0, %c0_i32 : i32, i32
  }
}

</mosaic_0001>

<bundles_post_ra>
// kernel: tpu_custom_call.1
= control target key start
LH: loop header
LB: loop body
LE: loop exit
PB: predicated region body
PF: predicated region fallthrough
CT: control target
= control target key end

     0   :  { %8 = vsyncpa [#allocation3], 0  ;;  %s202_s0 = inlined_call_operand.hbm [shape: f32[1,512], index: 0, kind: input, shape index: {}]   ;;  %s203_s1 = inlined_call_operand.hbm [shape: f32[1,512], index: 1, kind: input, shape index: {}]   ;;  %s204_s2 = inlined_call_operand.vmem [shape: f32[1,512], index: 2, kind: input, shape index: {}]   ;;  %s205_s3 = inlined_call_operand.hbm [shape: f32[1,512], index: 3, kind: output, shape index: {}]  }
   0x1   :  { %9 = vsyncpa [#allocation6], 0 }
   0x2   :  { %10 = vsyncpa [#allocation4], 0  ;;  %s140_s12 = smov [#allocation2]   ;;  %s141_s14 = smov [#allocation5]  }
   0x3   :  { %s17_s13 = sshll.u32 %s140_s12, 4  ;;  %s27_s15 = sshll.u32 %s141_s14, 4  ;;  %s18_s13 = int_to_ptr.vmem [resolvable:$true] %s17_s13  ;;  %s28_s15 = int_to_ptr.vmem [resolvable:$true] %s27_s15 }
   0x4   :  { %s68_s18 = scalar_lea.hbm %s202_s0, 64 }
   0x5   :  { %p69_p0 = scmp.ne.s32.totalorder %s202_s0, %s68_s18  ;;  %p72_p1 = scmp.lt.u32.totalorder %s68_s18, %s202_s0 }
   0x7   :  { %p74_p2 = pnand %p72_p1, %p69_p0 }
   0x9   :  { %77 = shalt.err (!%p74_p2)
}
   0xa   :  { %s78_s23 = scalar_lea.vmem %s18_s13, 64  ;;  %p83_p4 = scmp.lt.s32.totalorder %s18_s13, %s18_s13 }
   0xb   :  { %p79_p3 = scmp.ne.s32.totalorder %s18_s13, %s78_s23  ;;  %p84_p5 = scmp.lt.s32.totalorder %s78_s23, %s78_s23 }
   0xd   :  { %p85_p6 = por %p84_p5, %p83_p4 }
   0xf   :  { %p86_p7 = pnand %p85_p6, %p79_p3 }
  0x11   :  { %89 = shalt.err (!%p86_p7)
}
  0x12   :  { %20 = dma.hbm_to_vmem [thread:$0]  %s202_s0, 64, %s18_s13, [#allocation3]  }
  0x13   :  { %s90_s28 = scalar_lea.hbm %s203_s1, 64 }
  0x14   :  { %p91_p8 = scmp.ne.s32.totalorder %s203_s1, %s90_s28  ;;  %p94_p9 = scmp.lt.u32.totalorder %s90_s28, %s203_s1 }
  0x16   :  { %p96_p10 = pnand %p94_p9, %p91_p8 }
  0x18   :  { %99 = shalt.err (!%p96_p10)
}
  0x19   :  { %s100_s6 = scalar_lea.vmem %s28_s15, 64  ;;  %p105_p12 = scmp.lt.s32.totalorder %s28_s15, %s28_s15 }
  0x1a   :  { %p101_p11 = scmp.ne.s32.totalorder %s28_s15, %s100_s6  ;;  %p106_p13 = scmp.lt.s32.totalorder %s100_s6, %s100_s6 }
  0x1c   :  { %p107_p0 = por %p106_p13, %p105_p12 }
  0x1e   :  { %p108_p1 = pnand %p107_p0, %p101_p11 }
  0x20   :  { %111 = shalt.err (!%p108_p1)
}
  0x21   :  { %30 = dma.hbm_to_vmem [thread:$0]  %s203_s1, 64, %s28_s15, [#allocation6]  }
  0x22   :  { %134 = dma.done.wait [#allocation3], 64  }
  0x23   :  { %135 = vsyncadd [#allocation3], 4294967232 }
  0x24   :  { %136 = dma.done.wait [#allocation6], 64  }
  0x25   :  { %137 = vsyncadd [#allocation6], 4294967232  ;;  %v44_v0 = vlaneseq  ;;  %s142_s8 = smov [#allocation7]   ;;  %v39_v1 = vld [vmem:[#allocation2] sm:$0xf] }
  0x26   :  { %s55_s9 = sshll.u32 %s142_s8, 4  ;;  %v40_v2 = vld [vmem:[#allocation5] sm:$0xf]  ;;  %v42_v3 = vld [vmem:[%s204_s2] sm:$0xf]  ;;  %s56_s9 = int_to_ptr.vmem [resolvable:$true] %s55_s9 }
  0x27   :  { %v41_v4 = vadd.f32 %v40_v2, %v39_v1  ;;  %vm46_vm0 = vcmp.lt.s32.totalorder %v44_v0, 512  ;;  %s112_s12 = scalar_lea.vmem %s56_s9, 64  ;;  %p117_p3 = scmp.lt.s32.totalorder %s56_s9, %s56_s9 }
  0x28   :  { %p113_p2 = scmp.ne.s32.totalorder %s56_s9, %s112_s12  ;;  %p118_p4 = scmp.lt.s32.totalorder %s112_s12, %s112_s12 }
  0x29   :  { %v43_v5 = vadd.f32 %v42_v3, %v41_v4 }
  0x2a   :  { %p119_p5 = por %p118_p4, %p117_p3 }
  0x2b   :  { %48 = vst.msk [vmem:[#allocation7] sm:$0xf] %vm46_vm0, %v43_v5 }
  0x2c   :  { %p120_p6 = pnand %p119_p5, %p113_p2 }
  0x2e   :  { %123 = shalt.err (!%p120_p6)
}
  0x2f   :  { %s124_s14 = scalar_lea.hbm %s205_s3, 64 }
  0x30   :  { %p125_p7 = scmp.ne.s32.totalorder %s205_s3, %s124_s14  ;;  %p128_p8 = scmp.lt.u32.totalorder %s124_s14, %s205_s3 }
  0x32   :  { %p130_p9 = pnand %p128_p8, %p125_p7 }
  0x34   :  { %133 = shalt.err (!%p130_p9)
}
  0x35   :  { %58 = dma.vmem_to_hbm [thread:$0]  %s56_s9, 64, %s205_s3, [#allocation4]  }
  0x36   :  { %138 = dma.done.wait [#allocation4], 64  }
  0x37   :  { %139 = vsyncadd [#allocation4], 4294967232 }
  0x38   :  { %62 = vsyncpa [#allocation3], 1 }
  0x39   :  { %63 = vsyncpa [#allocation6], 1 }
  0x3a   :  { %64 = vsyncpa [#allocation4], 1 }

</bundles_post_ra>
